<compile_context>
chip_gen: v7x
topology: tpu7x:2x2x1
jax: 0.10.0
libtpu: 0.0.40
codegen_flags: <defaults>
</compile_context>

<pallas_src>
import functools

import jax
import jax.numpy as jnp
from jax import lax
from jax.experimental import pallas as pl
from jax.experimental.pallas import tpu as pltpu


def _round_up(n: int, m: int) -> int:
    return ((n + m - 1) // m) * m


def _mlp_kernel(x_ref, p_ref, o_ref, *, n_features: int, chunk: int):
    """One batch tile (batch on lanes) of out = tanh(x @ W1 + b1) @ W2 + b2.

    x_ref: (F, TB)   x^T batch tile, batch index along lanes.
    p_ref: (H, F+3)  columns [0:F] = W1^T, [F] = b1, [F+1] = W2, [F+2] = b2
                     (broadcast) -- VMEM-resident across all grid steps.
    o_ref: (1, TB)   one packed result per lane (lane k of grid step i is
                     batch row i*TB + k).
    """
    F = n_features
    H = p_ref.shape[0]
    tb = x_ref.shape[1]
    n_chunks = tb // chunk

    b1_col = p_ref[:, F:F + 1]          # (H, 1)
    w2_col = p_ref[:, F + 1:F + 2]      # (H, 1)
    b2 = p_ref[0:1, F + 2:F + 3]        # (1, 1)

    def body(j, carry):
        base = pl.multiple_of(j * chunk, chunk)
        xs = x_ref[:, pl.ds(base, chunk)]                      # (F, chunk)

        # ---- layer 1: F unrolled outer-product broadcast-FMAs on the VPU,
        # accumulator (H, chunk) is fully lane-packed.
        acc = jnp.broadcast_to(b1_col, (H, chunk))
        for f in range(F):                                     # F is tiny
            acc = acc + p_ref[:, f:f + 1] * xs[f:f + 1, :]
        h = jnp.tanh(acc)                                      # EUP, full vregs

        # ---- layer 2 (O == 1): VPU multiply + cross-sublane reduce (XLU),
        # producing one lane-dense row of results for this sub-chunk.
        out_row = jnp.sum(h * w2_col, axis=0, keepdims=True) + b2   # (1, chunk)
        o_ref[:, pl.ds(base, chunk)] = out_row.astype(o_ref.dtype)
        return carry

    lax.fori_loop(0, n_chunks, body, 0)


def _pallas_forward(x, w1, b1, w2, b2, *, block_b: int, chunk: int):
    B, F = x.shape
    H = w1.shape[1]
    chunk = _round_up(chunk, 128)

    # Batch tile: multiple of the inner chunk; keep >= 2 grid steps once B is
    # large enough so the "parallel" grid axis can shard over v7x's two TCs.
    half = _round_up((B + 1) // 2, chunk)
    tb = _round_up(min(max(block_b, chunk), half), chunk)
    n_blocks = -(-B // tb)          # cdiv; last tile over-reads, tail discarded

    # Batch-on-lanes: feed x^T so all intermediates are lane-packed.
    xT = x.astype(jnp.float32).T                                   # (F, B)

    # Consolidated parameter slab -> one small VMEM-resident block (one DMA).
    w1t = w1.astype(jnp.float32).T                                 # (H, F)
    b1c = b1.reshape(H, 1).astype(jnp.float32)
    w2c = w2.reshape(H, 1).astype(jnp.float32)
    b2c = jnp.broadcast_to(b2.reshape(1, 1).astype(jnp.float32), (H, 1))
    params = jnp.concatenate([w1t, b1c, w2c, b2c], axis=1)         # (H, F+3)

    out = pl.pallas_call(
        functools.partial(_mlp_kernel, n_features=F, chunk=chunk),
        out_shape=jax.ShapeDtypeStruct((1, n_blocks * tb), jnp.float32),
        grid=(n_blocks,),
        in_specs=[
            pl.BlockSpec((F, tb), lambda i: (0, i)),        # streamed x^T tile
            pl.BlockSpec((H, F + 3), lambda i: (0, 0)),     # params: resident
        ],
        out_specs=pl.BlockSpec((1, tb), lambda i: (0, i)),  # lane-packed result
        compiler_params=pltpu.CompilerParams(
            dimension_semantics=("parallel",)),
    )(xT, params)

    # Element k of the packed row is batch row k; drop the over-read tail.
    return out.reshape(-1)[:B].reshape(B, 1).astype(x.dtype)


@functools.partial(jax.jit,
                   static_argnames=("block_b", "chunk", "min_pallas_batch"))
def batch_single_layer(x, w1, b1, w2, b2, *, block_b=32768, chunk=512,
                       min_pallas_batch=512):
    """Forward of BatchSingleLayer: out = tanh(x @ w1 + b1) @ w2 + b2.

    x: (B, F); w1: (F, H); b1: (H,) or (1, H); w2: (H, O); b2: (O,) or (1, O).
    """
    B = x.shape[0]
    O = w2.shape[1]
    if O != 1 or B < max(min_pallas_batch, _round_up(chunk, 128)):
        # TODO(synk): n_output != 1 and overhead-bound tiny batches use a fused
        # XLA path instead of the lane-packed Pallas kernel.
        h = jnp.tanh(x @ w1 + b1.reshape(1, -1))
        return h @ w2 + b2.reshape(1, -1)
    return _pallas_forward(x, w1, b1, w2, b2, block_b=block_b, chunk=chunk)


def _reference(x, w1, b1, w2, b2):
    h = jnp.tanh(x @ w1 + b1.reshape(1, -1))
    return h @ w2 + b2.reshape(1, -1)


if __name__ == "__main__":
    # Module: BatchSingleLayer(n_features=4, n_hidden=32, n_output=1)
    F, H, O = 4, 32, 1
    key = jax.random.PRNGKey(0)
    kx, kw1, kb1, kw2, kb2 = jax.random.split(key, 5)

    # Deterministic init mimicking torch.nn.Linear's uniform(-1/sqrt(fan_in), .)
    bound1 = 1.0 / (F ** 0.5)
    w1 = jax.random.uniform(kw1, (F, H), minval=-bound1, maxval=bound1,
                            dtype=jnp.float32)
    b1 = jax.random.uniform(kb1, (1, H), minval=-bound1, maxval=bound1,
                            dtype=jnp.float32)
    bound2 = 1.0 / (H ** 0.5)
    w2 = jax.random.uniform(kw2, (H, O), minval=-bound2, maxval=bound2,
                            dtype=jnp.float32)
    b2 = jax.random.uniform(kb2, (1, O), minval=-bound2, maxval=bound2,
                            dtype=jnp.float32)

    def check(B, **kw):
        x = jax.random.normal(jax.random.fold_in(kx, B), (B, F),
                              dtype=jnp.float32)
        out = jax.block_until_ready(batch_single_layer(x, w1, b1, w2, b2, **kw))
        ref = _reference(x, w1, b1, w2, b2)
        assert out.shape == (B, O), (out.shape, (B, O))
        err = float(jnp.max(jnp.abs(out - ref)))
        assert jnp.allclose(out, ref, atol=1e-5, rtol=1e-4), (
            f"mismatch at B={B}: max err {err}")

    # Pallas path: 2 grid steps, 2 inner sub-chunks, lane-packed output.
    check(2048)
    # Pallas path: ragged batch -> partial final tile over-reads, tail dropped.
    check(200, block_b=128, chunk=128, min_pallas_batch=1)
    # Tiny batch: overhead-bound -> fused-XLA fallback path.
    check(8)

    print("KERNEL_OK")
</pallas_src>

<mosaic_0001>
module attributes {stable_mosaic.version = 11 : i64} {
  func.func @_mlp_kernel(%arg0: i32, %arg1: memref<4x1024xf32, #tpu.memory_space<vmem>>, %arg2: memref<32x7xf32, #tpu.memory_space<vmem>>, %arg3: memref<1x1024xf32, #tpu.memory_space<vmem>>) attributes {dimension_semantics = [#tpu.dimension_semantics<parallel>], iteration_bounds = array<i64: 2>, scalar_prefetch = 0 : i64, scratch_operands = 0 : i64, tpu.core_type = #tpu.core_type<tc>, window_params = [{transform_indices = @transform_0, window_bounds = array<i64: 4, 1024>}, {pipeline_mode = #tpu.pipeline_mode<synchronous>, transform_indices = @transform_1, window_bounds = array<i64: 32, 7>}, {transform_indices = @transform_2, window_bounds = array<i64: 1, 1024>}]} {
    %c0 = arith.constant 0 : index
    %c4 = arith.constant 4 : index
    %0 = vector.load %arg2[%c0, %c4] : memref<32x7xf32, #tpu.memory_space<vmem>>, vector<32x1xf32>
    %c0_0 = arith.constant 0 : index
    %c5 = arith.constant 5 : index
    %1 = vector.load %arg2[%c0_0, %c5] : memref<32x7xf32, #tpu.memory_space<vmem>>, vector<32x1xf32>
    %c0_1 = arith.constant 0 : index
    %c6 = arith.constant 6 : index
    %2 = vector.load %arg2[%c0_1, %c6] : memref<32x7xf32, #tpu.memory_space<vmem>>, vector<1x1xf32>
    %c0_i32 = arith.constant 0 : i32
    %c2_i32 = arith.constant 2 : i32
    %3 = arith.addi %c0_i32, %c2_i32 : i32
    %c1_i32 = arith.constant 1 : i32
    scf.for %arg4 = %c0_i32 to %3 step %c1_i32  : i32 {
      %c512_i32 = arith.constant 512 : i32
      %4 = arith.muli %arg4, %c512_i32 : i32
      %5 = tpu.assume_multiple %4, 512 : i32
      %c0_3 = arith.constant 0 : index
      %6 = arith.index_cast %5 : i32 to index
      %7 = vector.load %arg1[%c0_3, %6] : memref<4x1024xf32, #tpu.memory_space<vmem>>, vector<4x512xf32>
      %8 = vector.shape_cast %0 : vector<32x1xf32> to vector<32x1xf32>
      %9 = vector.broadcast %8 : vector<32x1xf32> to vector<32x512xf32>
      %c0_4 = arith.constant 0 : index
      %c0_5 = arith.constant 0 : index
      %10 = vector.load %arg2[%c0_4, %c0_5] : memref<32x7xf32, #tpu.memory_space<vmem>>, vector<32x1xf32>
      %11 = vector.extract_strided_slice %7 {offsets = [0, 0], sizes = [1, 512], strides = [1, 1]} : vector<4x512xf32> to vector<1x512xf32>
      %12 = vector.broadcast %10 : vector<32x1xf32> to vector<32x512xf32>
      %13 = vector.broadcast %11 : vector<1x512xf32> to vector<32x512xf32>
      %14 = arith.mulf %12, %13 : vector<32x512xf32>
      %15 = arith.addf %9, %14 : vector<32x512xf32>
      %c0_6 = arith.constant 0 : index
      %c1 = arith.constant 1 : index
      %16 = vector.load %arg2[%c0_6, %c1] : memref<32x7xf32, #tpu.memory_space<vmem>>, vector<32x1xf32>
      %17 = vector.extract_strided_slice %7 {offsets = [1, 0], sizes = [1, 512], strides = [1, 1]} : vector<4x512xf32> to vector<1x512xf32>
      %18 = vector.broadcast %16 : vector<32x1xf32> to vector<32x512xf32>
      %19 = vector.broadcast %17 : vector<1x512xf32> to vector<32x512xf32>
      %20 = arith.mulf %18, %19 : vector<32x512xf32>
      %21 = arith.addf %15, %20 : vector<32x512xf32>
      %c0_7 = arith.constant 0 : index
      %c2 = arith.constant 2 : index
      %22 = vector.load %arg2[%c0_7, %c2] : memref<32x7xf32, #tpu.memory_space<vmem>>, vector<32x1xf32>
      %23 = vector.extract_strided_slice %7 {offsets = [2, 0], sizes = [1, 512], strides = [1, 1]} : vector<4x512xf32> to vector<1x512xf32>
      %24 = vector.broadcast %22 : vector<32x1xf32> to vector<32x512xf32>
      %25 = vector.broadcast %23 : vector<1x512xf32> to vector<32x512xf32>
      %26 = arith.mulf %24, %25 : vector<32x512xf32>
      %27 = arith.addf %21, %26 : vector<32x512xf32>
      %c0_8 = arith.constant 0 : index
      %c3 = arith.constant 3 : index
      %28 = vector.load %arg2[%c0_8, %c3] : memref<32x7xf32, #tpu.memory_space<vmem>>, vector<32x1xf32>
      %29 = vector.extract_strided_slice %7 {offsets = [3, 0], sizes = [1, 512], strides = [1, 1]} : vector<4x512xf32> to vector<1x512xf32>
      %30 = vector.broadcast %28 : vector<32x1xf32> to vector<32x512xf32>
      %31 = vector.broadcast %29 : vector<1x512xf32> to vector<32x512xf32>
      %32 = arith.mulf %30, %31 : vector<32x512xf32>
      %33 = arith.addf %27, %32 : vector<32x512xf32>
      %34 = math.tanh %33 : vector<32x512xf32>
      %35 = vector.broadcast %1 : vector<32x1xf32> to vector<32x512xf32>
      %36 = arith.mulf %34, %35 : vector<32x512xf32>
      %cst = arith.constant dense<0.000000e+00> : vector<512xf32>
      %37 = vector.multi_reduction <add>, %36, %cst [0] : vector<32x512xf32> to vector<512xf32>
      %38 = vector.shape_cast %37 : vector<512xf32> to vector<1x512xf32>
      %39 = vector.broadcast %2 : vector<1x1xf32> to vector<1x512xf32>
      %40 = arith.addf %38, %39 : vector<1x512xf32>
      %c0_9 = arith.constant 0 : index
      %41 = arith.index_cast %5 : i32 to index
      %42 = vector.load %arg3[%c0_9, %41] : memref<1x1024xf32, #tpu.memory_space<vmem>>, vector<1x512xf32>
      tpu.vector_store %arg3[%c0_9, %41], %40 {strides = array<i32>} : memref<1x1024xf32, #tpu.memory_space<vmem>>, vector<1x512xf32>,
    }
    %c2_i32_2 = arith.constant 2 : i32
    return
  }
  func.func @transform_0(%arg0: i32) -> (i32, i32) {
    %c0_i32 = arith.constant 0 : i32
    %c0_i32_0 = arith.constant 0 : i32
    return %c0_i32, %arg0 : i32, i32
  }
  func.func @transform_1(%arg0: i32) -> (i32, i32) {
    %c0_i32 = arith.constant 0 : i32
    %c0_i32_0 = arith.constant 0 : i32
    %c0_i32_1 = arith.constant 0 : i32
    return %c0_i32, %c0_i32_0 : i32, i32
  }
  func.func @transform_2(%arg0: i32) -> (i32, i32) {
    %c0_i32 = arith.constant 0 : i32
    %c0_i32_0 = arith.constant 0 : i32
    return %c0_i32, %arg0 : i32, i32
  }
}

</mosaic_0001>

<bundles_post_ra>
// kernel: batch_single_layer.1
= control target key start
LH: loop header
LB: loop body
LE: loop exit
PB: predicated region body
PF: predicated region fallthrough
CT: control target
= control target key end

     0   :  { %7 = vsyncpa [#allocation3], 0  ;;  %s1271_s0 = inlined_call_operand.vmem [shape: f32[4,2048], index: 0, kind: input, shape index: {}]   ;;  %s1272_s1 = inlined_call_operand.vmem [shape: f32[32,7], index: 1, kind: input, shape index: {}]   ;;  %s1273_s2 = inlined_call_operand.hbm [shape: f32[1,2048], index: 2, kind: output, shape index: {}]  }
   0x1   :  { %9 = vsyncpa [#allocation3 + $0x1], 0  ;;  %s954_s9 = smov 0   ;;  %s956_s10 = smov 0  }
   0x2   :  { %s958_s11 = smov 0   ;;  %s960_s12 = smov 0  }
   0x3 LB: > { %s975_s13 = sadd.s32 4294967295, %s924_s12   ;;  %s739_s14 = sadd.s32 4294967294, %s924_s12   ;;  %s924_s12 = sphi %s960_s12, %s1279_s12   ;;  %s920_s11 = sphi %s958_s11, %s1278_s11   ;;  %s916_s10 = sphi %s956_s10, %s1277_s10   ;;  %s912_s9 = sphi %s954_s9, %s1276_s9  }
   0x4   : > { %s979_s15 = sadd.s32 1, %s924_s12   ;;  %s69_s16 = sadd.s32 1, %s920_s11 }
   0x5   : > { %s66_s17 = ssub.s32 %s924_s12, %s979_s15  ;;  %p79_p0 = scmp.ne.s32.totalorder %s920_s11, %s916_s10 }
   0x6   : > { %p67_p1 = scmp.eq.s32.totalorder %s66_s17, 0  ;;  %p80_p2 = scmp.eq.s32.totalorder %s975_s13, 1 }
   0x7   : > { %p85_p3 = scmp.ne.s32.totalorder %s916_s10, %s912_s9  ;;  %p86_p4 = scmp.eq.s32.totalorder %s739_s14, 1 }
   0x8   : > { %s990_s18 = scalar_select %p67_p1, %s920_s11, %s69_s16  }
   0x9   : > { %p992_p5 = por %p80_p2, %p79_p0  ;;  %p996_p6 = por %p86_p4, %p85_p3 }
   0xa   : > { %p742_p7 = scmp.ge.s32.totalorder %s924_s12, 1  ;;  %p116_p8 = scmp.lt.s32.totalorder %s924_s12, 3 }
   0xc   : > { %p117_p9 = pnand %p742_p7, %p116_p8 }
   0xd   : > { %s135_s21 = sand.u32 (!%p117_p9), 1, %s916_s10   ;;  %s744_s22 = sshll.u32 (!%p117_p9), %s975_s13, 3  ;;  %v1007_v0 = vld [vmem:[%s1272_s1] sm:$0xff] (!%p117_p9)  ;;  %v1012_v1 = vld [vmem:[%s1272_s1 + $0x8] sm:$0xff] (!%p117_p9)  ;;  %v1017_v2 = vld [vmem:[%s1272_s1 + $0x10] sm:$0xff] (!%p117_p9) }
   0xe   : > { %120 = sbr.rel (%p117_p9) target bundleno = 264 (0x108), region = 28  ;;  %s1021_s29 = sshll.u32 (!%p117_p9), %s135_s21, 3  ;;  %v1026_v3 = vld [vmem:[%s1272_s1 + $0x18] sm:$0xff] (!%p117_p9)  ;;  %v1031_v4 = vld [vmem:[%s1272_s1] sm:$0x1] (!%p117_p9) }
   0xf   : > { %p139_p10 = scmp.lt.s32.totalorder (!%p117_p9), %s744_s22, 15  ;;  %s137_s16 = scalar_lea.vmem (!%p117_p9), [#allocation2], %s1021_s29 }
  0x10   : > { %s1039_s17 = smov (!%p117_p9), 0  }
  0x15   : > { %s1281_s22 = smov (!%p139_p10, %s744_s22), 15 }
  0x16   : > { %s745_s6 = sshll.u32 %s1281_s22, 2 }
  0x17   : > { %s1036_s14 = scalar_lea.vmem %s1271_s0, %s745_s6 }
  0x18 LB: >> { %v183_v5 = vld [vmem:[%s1272_s1] sm:$0xff]  ;;  %v930_v6 = vmov 0   ;;  %v931_v7 = vmov 4   ;;  %v184_v8 = vld [vmem:[%s1272_s1 + $0x8] sm:$0xff]  ;;  %v185_v9 = vld [vmem:[%s1272_s1 + $0x10] sm:$0xff]  ;;  %v932_v10 = vmov 1   ;;  %v209_v16 = vlaneseq  ;;  %s928_s17 = sphi %s1039_s17, %s155_s17  }
  0x19   : >> { %809 = vset.pattern.permute.xlu0 %v930_v6  ;;  %810 = vset.pattern.permute.xlu1 %v931_v7  ;;  %v186_v11 = vld [vmem:[%s1272_s1 + $0x18] sm:$0xff]  ;;  %v933_v12 = vmov 2   ;;  %v934_v13 = vmov 3   ;;  %v935_v14 = vmov 5   ;;  %v936_v15 = vmov 6   ;;  %s746_s3 = sshll.u32 %s928_s17, 9 }
  0x1a   : >> { %189 = vperm.xlu0 %809, %v183_v5   ;;  %165 = vperm.xlu1 %810, %v1007_v0   ;;  %s1066_s4 = sshra.s32 %s746_s3, 7  ;;  %v1072_v19 = vshrl.u32 %v209_v16, 7  ;;  %vm654_vm0 = vcmp.lt.s32.totalorder %v209_v16, 512  ;;  %s155_s17 = sadd.s32 1, %s928_s17  }
  0x1b   : >> { %s747_s5 = sshll.u32 %s1066_s4, 2  ;;  %s651_s7 = scalar_lea.vmem %s137_s16, %s1066_s4 [#allocation2] }
  0x1c   : >> { %s160_s6 = scalar_lea.vmem %s1036_s14, %s747_s5  ;;  %v211_v22 = vsub.s32 0, %v1072_v19  ;;  %v215_v23 = vsub.s32 4, %v1072_v19  ;;  %v295_v26 = vsub.s32 1, %v1072_v19  ;;  %v299_v27 = vsub.s32 5, %v1072_v19  ;;  %p152_p11 = scmp.ge.s32.totalorder %s155_s17, 2  }
  0x1d   : >> { %v161_v24 = vld [vmem:[%s160_s6] sm:$0xff]  ;;  %v162_v25 = vld [vmem:[%s160_s6 + $0x8] sm:$0xff]  ;;  %v379_v35 = vsub.s32 2, %v1072_v19  ;;  %v383_v36 = vsub.s32 6, %v1072_v19  ;;  %v463_v40 = vsub.s32 3, %v1072_v19  ;;  %v467_v41 = vsub.s32 7, %v1072_v19 }
  0x1e   : >> { %194 = vperm.xlu0 %809, %v184_v8   ;;  %170 = vperm.xlu1 %810, %v1012_v1   ;;  %v212_v29 = vrot.slane %v161_v24, %v211_v22  ;;  %v216_v30 = vrot.slane %v161_v24, %v215_v23  ;;  %v220_v31 = vrot.slane %v162_v25, %v211_v22  ;;  %s753_s8 = sshll.u32 (%p152_p11), %s975_s13, 7  ;;  %s672_s25 = sshll.u32 (%p152_p11), %s137_s16, 4  ;;  %s673_s25 = int_to_ptr.vmem [resolvable:$true] %s672_s25 }
  0x1f   : >> { %v224_v32 = vrot.slane %v162_v25, %v215_v23  ;;  %v296_v34 = vrot.slane %v161_v24, %v295_v26  ;;  %v300_v37 = vrot.slane %v161_v24, %v299_v27  ;;  %v304_v38 = vrot.slane %v162_v25, %v295_v26  ;;  %s1231_s22 = scalar_lea.hbm (%p152_p11), %s1273_s2, %s753_s8  ;;  %s658_s26 = scalar_lea.sflag (%p152_p11), [#allocation3], %s135_s21 }
  0x20   : >> { %v308_v39 = vrot.slane %v162_v25, %v299_v27  ;;  %v1087_v42 = vrot.slane %v212_v29, %v211_v22  ;;  %v1089_v43 = vrot.slane %v216_v30, %v211_v22  ;;  %v1091_v44 = vrot.slane %v220_v31, %v211_v22  ;;  %s858_s27 = scalar_lea.vmem (%p152_p11), %s673_s25, 128  ;;  %s938_s14 = smov (%p152_p11), [#allocation2]  }
  0x21   : >> { %v1093_v45 = vrot.slane %v224_v32, %v211_v22  ;;  %v1095_v47 = vrot.slane %v296_v34, %v295_v26  ;;  %v380_v49 = vrot.slane %v161_v24, %v379_v35  ;;  %v384_v50 = vrot.slane %v161_v24, %v383_v36  ;;  %p859_p12 = scmp.ne.s32.totalorder (%p152_p11), %s673_s25, %s858_s27  ;;  %s862_s17 = sshll.u32 (%p152_p11), %s938_s14, 4  ;;  %s863_s17 = int_to_ptr.vmem [resolvable:$false] %s862_s17 }
  0x22   : >> { %199 = vperm.xlu0 %809, %v185_v9   ;;  %811 = vset.pattern.permute.xlu1 %v932_v10  ;;  %v388_v51 = vrot.slane %v162_v25, %v379_v35  ;;  %v1099_v52 = vrot.slane %v300_v37, %v295_v26  ;;  %v1101_v53 = vrot.slane %v304_v38, %v295_v26  ;;  %s864_s28 = scalar_lea.vmem (%p152_p11), %s863_s17, 256  ;;  %p865_p1 = scmp.lt.s32.totalorder (%p152_p11), %s673_s25, %s863_s17 }
  0x23   : >> { %278 = vperm.xlu1 %811, %v183_v5   ;;  %v1103_v54 = vrot.slane %v308_v39, %v295_v26  ;;  %v392_v55 = vrot.slane %v162_v25, %v383_v36  ;;  %v464_v56 = vrot.slane %v161_v24, %v463_v40  ;;  %v468_v57 = vrot.slane %v161_v24, %v467_v41  ;;  %p860_p13 = pnand (%p152_p11), %p859_p12, %p992_p5  ;;  %p866_p2 = scmp.lt.s32.totalorder (%p152_p11), %s864_s28, %s858_s27 }
  0x24   : >> { %v472_v58 = vrot.slane %v162_v25, %v463_v40  ;;  %v476_v59 = vrot.slane %v162_v25, %v467_v41 }
  0x25   : > { %p861_p0 = pneg (%p152_p11), %p860_p13  ;;  %p867_p3 = por (%p152_p11), %p866_p2, %p865_p1 }
  0x26   : >> { %812 = vset.pattern.permute.xlu0 %v932_v10  ;;  %v1125_v22 = vrot.slane %v472_v58, %v463_v40  ;;  %v1127_v23 = vrot.slane %v476_v59, %v463_v40 }
  0x27   : >> { %282 = vperm.xlu0 %812, %v184_v8   ;;  %813 = vset.pattern.permute.xlu1 %v931_v7  ;;  %p868_p4 = pnand (%p152_p11), %p867_p3, %p861_p0 }
  0x28   : >> { %175 = vperm.xlu1 %813, %v1017_v2  }
  0x2b   : >> { %286 = vperm.xlu0 %812, %v185_v9  }
  0x2c   : >> { %814 = vset.pattern.permute.xlu1 %v930_v6 }
  0x2d   : >> { %204 = vperm.xlu1 %814, %v186_v11  }
  0x2f   : >> { %816 = vset.pattern.permute.xlu0 %v933_v12 }
  0x30   : >> { %366 = vperm.xlu0 %816, %v184_v8  }
  0x31   : >> { %815 = vset.pattern.permute.xlu1 %v933_v12 }
  0x32   : >> { %362 = vperm.xlu1 %815, %v183_v5  }
  0x34   : >> { %370 = vperm.xlu0 %816, %v185_v9  }
  0x36   : >> { %817 = vset.pattern.permute.xlu1 %v931_v7  ;;  %v1110_v7 = vrot.slane %v380_v49, %v379_v35 }
  0x37   : >> { %180 = vperm.xlu1 %817, %v1026_v3  }
  0x38   : >> { %820 = vset.pattern.permute.xlu0 %v934_v13 }
  0x39   : >> { %450 = vperm.xlu0 %820, %v184_v8   ;;  %v1112_v8 = vrot.slane %v384_v50, %v379_v35 }
  0x3b   : >> { %818 = vset.pattern.permute.xlu1 %v932_v10 }
  0x3c   : >> { %290 = vperm.xlu1 %818, %v186_v11  }
  0x3d   : >> { %458 = vperm.xlu0 %820, %v186_v11  }
  0x40   : >> { %819 = vset.pattern.permute.xlu1 %v934_v13 }
  0x41   : >> { %446 = vperm.xlu1 %819, %v183_v5   ;;  %824 = vset.pattern.permute.xlu0 %v935_v14 }
  0x42   : >> { %550 = vperm.xlu0 %824, %v1012_v1  }
  0x45   : >> { %821 = vset.pattern.permute.xlu1 %v933_v12 }
  0x46   : >> { %374 = vperm.xlu1 %821, %v186_v11   ;;  %825 = vset.pattern.permute.xlu0 %v936_v15  ;;  %v1121_v15 = vrot.slane %v464_v56, %v463_v40 }
  0x47   : >> { %615 = vperm.xlu0 %825, %v1031_v4  }
  0x4a   : >> { %822 = vset.pattern.permute.xlu1 %v934_v13 }
  0x4b   : >> { %454 = vperm.xlu1 %822, %v185_v9   ;;  %v1114_v9 = vrot.slane %v388_v51, %v379_v35 }
  0x4f   : >> { %823 = vset.pattern.permute.xlu1 %v935_v14  ;;  %v1119_v14 = vrot.slane %v392_v55, %v379_v35 }
  0x50   : >> { %546 = vperm.xlu1 %823, %v1007_v0  }
  0x54   : >> { %554 = vperm.xlu1 %823, %v1017_v2  }
  0x58   : >> { %558 = vperm.xlu1 %823, %v1026_v3  }
  0x99   : >> { %v190_v17 = vpop.permute.xlu0 %189  ;;  %v1069_v18 = vpop.permute.xlu1 %165 }
  0x9a   : >> { %v245_v60 = vmul.f32 %v1087_v42, %v190_v17  ;;  %v246_v61 = vmul.f32 %v1089_v43, %v190_v17  ;;  %v247_v62 = vmul.f32 %v1091_v44, %v190_v17  ;;  %v248_v63 = vmul.f32 %v1093_v45, %v190_v17 }
  0x9b   : >> { %v1123_v17 = vrot.slane %v468_v57, %v463_v40 }
  0x9c   : >> { %v261_v24 = vadd.f32 %v245_v60, %v1069_v18  ;;  %v262_v25 = vadd.f32 %v246_v61, %v1069_v18  ;;  %v263_v26 = vadd.f32 %v247_v62, %v1069_v18  ;;  %v264_v27 = vadd.f32 %v248_v63, %v1069_v18 }
  0x9d   : >> { %v195_v20 = vpop.permute.xlu0 %194  ;;  %v1075_v21 = vpop.permute.xlu1 %170 }
  0x9e   : >> { %v249_v6 = vmul.f32 %v1087_v42, %v195_v20  ;;  %v250_v10 = vmul.f32 %v1089_v43, %v195_v20  ;;  %v251_v11 = vmul.f32 %v1091_v44, %v195_v20  ;;  %v252_v12 = vmul.f32 %v1093_v45, %v195_v20 }
  0xa0   : >> { %v265_v20 = vadd.f32 %v249_v6, %v1075_v21  ;;  %v266_v34 = vadd.f32 %v250_v10, %v1075_v21  ;;  %v267_v35 = vadd.f32 %v251_v11, %v1075_v21  ;;  %v268_v36 = vadd.f32 %v252_v12, %v1075_v21 }
  0xa1   : >> { %v1081_v28 = vpop.permute.xlu0 %199 }
  0xa2   : >> { %v279_v33 = vpop.permute.xlu1 %278  ;;  %v253_v18 = vmul.f32 %v1087_v42, %v1081_v28  ;;  %v254_v38 = vmul.f32 %v1089_v43, %v1081_v28  ;;  %v255_v39 = vmul.f32 %v1091_v44, %v1081_v28  ;;  %v256_v40 = vmul.f32 %v1093_v45, %v1081_v28 }
  0xa3   : >> { %v329_v29 = vmul.f32 %v1095_v47, %v279_v33  ;;  %v330_v30 = vmul.f32 %v1099_v52, %v279_v33  ;;  %v331_v31 = vmul.f32 %v1101_v53, %v279_v33  ;;  %v332_v37 = vmul.f32 %v1103_v54, %v279_v33 }
  0xa5   : >> { %v345_v51 = vadd.f32 %v329_v29, %v261_v24  ;;  %v346_v55 = vadd.f32 %v330_v30, %v262_v25  ;;  %v347_v56 = vadd.f32 %v331_v31, %v263_v26  ;;  %v348_v59 = vadd.f32 %v332_v37, %v264_v27 }
  0xa6   : >> { %v283_v46 = vpop.permute.xlu0 %282 }
  0xa7   : >> { %v1097_v48 = vpop.permute.xlu1 %175  ;;  %v333_v49 = vmul.f32 %v1095_v47, %v283_v46  ;;  %v334_v50 = vmul.f32 %v1099_v52, %v283_v46  ;;  %v335_v21 = vmul.f32 %v1101_v53, %v283_v46  ;;  %v336_v33 = vmul.f32 %v1103_v54, %v283_v46 }
  0xa8   : >> { %v269_v62 = vadd.f32 %v253_v18, %v1097_v48  ;;  %v270_v63 = vadd.f32 %v254_v38, %v1097_v48  ;;  %v271_v6 = vadd.f32 %v255_v39, %v1097_v48  ;;  %v272_v46 = vadd.f32 %v256_v40, %v1097_v48 }
  0xa9   : >> { %v349_v10 = vadd.f32 %v333_v49, %v265_v20  ;;  %v350_v11 = vadd.f32 %v334_v50, %v266_v34  ;;  %v351_v12 = vadd.f32 %v335_v21, %v267_v35  ;;  %v352_v24 = vadd.f32 %v336_v33, %v268_v36 }
  0xaa   : >> { %v287_v5 = vpop.permute.xlu0 %286 }
  0xab   : >> { %v337_v57 = vmul.f32 %v1095_v47, %v287_v5  ;;  %v338_v60 = vmul.f32 %v1099_v52, %v287_v5  ;;  %v339_v28 = vmul.f32 %v1101_v53, %v287_v5  ;;  %v340_v61 = vmul.f32 %v1103_v54, %v287_v5 }
  0xac   : >> { %v205_v13 = vpop.permute.xlu1 %204 }
  0xad   : >> { %v1161_v26 = vadd.f32 %v337_v57, %v269_v62  ;;  %v1166_v30 = vadd.f32 %v338_v60, %v270_v63  ;;  %v1168_v31 = vadd.f32 %v339_v28, %v271_v6  ;;  %v1170_v37 = vadd.f32 %v340_v61, %v272_v46 }
  0xae   : >> { %v257_v34 = vmul.f32 %v1087_v42, %v205_v13  ;;  %v258_v35 = vmul.f32 %v1089_v43, %v205_v13  ;;  %v259_v36 = vmul.f32 %v1091_v44, %v205_v13  ;;  %v260_v38 = vmul.f32 %v1093_v45, %v205_v13 }
  0xaf   : >> { %v367_v32 = vpop.permute.xlu0 %366 }
  0xb0   : >> { %v417_v27 = vmul.f32 %v1110_v7, %v367_v32  ;;  %v418_v29 = vmul.f32 %v1112_v8, %v367_v32  ;;  %v419_v5 = vmul.f32 %v1114_v9, %v367_v32  ;;  %v420_v48 = vmul.f32 %v1119_v14, %v367_v32 }
  0xb1   : >> { %v363_v41 = vpop.permute.xlu1 %362 }
  0xb2   : >> { %v413_v18 = vmul.f32 %v1110_v7, %v363_v41  ;;  %v414_v39 = vmul.f32 %v1112_v8, %v363_v41  ;;  %v415_v40 = vmul.f32 %v1114_v9, %v363_v41  ;;  %v433_v50 = vadd.f32 %v417_v27, %v349_v10 }
  0xb3   : >> { %v371_v58 = vpop.permute.xlu0 %370  ;;  %v434_v21 = vadd.f32 %v418_v29, %v350_v11  ;;  %v435_v32 = vadd.f32 %v419_v5, %v351_v12  ;;  %v416_v33 = vmul.f32 %v1119_v14, %v363_v41  ;;  %v436_v57 = vadd.f32 %v420_v48, %v352_v24 }
  0xb4   : >> { %v421_v43 = vmul.f32 %v1110_v7, %v371_v58  ;;  %v429_v45 = vadd.f32 %v413_v18, %v345_v51  ;;  %v422_v13 = vmul.f32 %v1112_v8, %v371_v58  ;;  %v1187_v28 = vmul.f32 %v1114_v9, %v371_v58 }
  0xb5   : >> { %v1190_v61 = vmul.f32 %v1119_v14, %v371_v58  ;;  %v430_v62 = vadd.f32 %v414_v39, %v346_v55  ;;  %v431_v63 = vadd.f32 %v415_v40, %v347_v56  ;;  %v432_v46 = vadd.f32 %v416_v33, %v348_v59 }
  0xb6   : >> { %v181_v25 = vpop.permute.xlu1 %180 }
  0xb7   : >> { %v273_v10 = vadd.f32 %v257_v34, %v181_v25  ;;  %v274_v11 = vadd.f32 %v258_v35, %v181_v25  ;;  %v275_v12 = vadd.f32 %v259_v36, %v181_v25 }
  0xb8   : >> { %v451_v20 = vpop.permute.xlu0 %450 }
  0xb9   : >> { %v501_v49 = vmul.f32 %v1121_v15, %v451_v20  ;;  %v502_v44 = vmul.f32 %v1123_v17, %v451_v20  ;;  %v503_v60 = vmul.f32 %v1125_v22, %v451_v20  ;;  %v504_v41 = vmul.f32 %v1127_v23, %v451_v20 }
  0xba   : >> { %v276_v20 = vadd.f32 %v260_v38, %v181_v25 }
  0xbb   : >> { %v291_v42 = vpop.permute.xlu1 %290  ;;  %v517_v6 = vadd.f32 %v501_v49, %v433_v50  ;;  %v518_v24 = vadd.f32 %v502_v44, %v434_v21  ;;  %v519_v27 = vadd.f32 %v503_v60, %v435_v32  ;;  %v520_v59 = vadd.f32 %v504_v41, %v436_v57 }
  0xbc   : >> { %v341_v51 = vmul.f32 %v1095_v47, %v291_v42  ;;  %v342_v29 = vmul.f32 %v1099_v52, %v291_v42  ;;  %v343_v48 = vmul.f32 %v1101_v53, %v291_v42  ;;  %v344_v58 = vmul.f32 %v1103_v54, %v291_v42  ;;  %v459_v35 = vpop.permute.xlu0 %458 }
  0xbd   : >> { %826 = vtanh.f32 %v517_v6  ;;  %v509_v47 = vmul.f32 %v1121_v15, %v459_v35  ;;  %v510_v52 = vmul.f32 %v1123_v17, %v459_v35  ;;  %v511_v53 = vmul.f32 %v1125_v22, %v459_v35 }
  0xbe   : >> { %828 = vtanh.f32 %v518_v24  ;;  %v357_v54 = vadd.f32 %v341_v51, %v273_v10  ;;  %v358_v18 = vadd.f32 %v342_v29, %v274_v11  ;;  %v359_v40 = vadd.f32 %v343_v48, %v275_v12 }
  0xbf   : >> { %830 = vtanh.f32 %v519_v27  ;;  %v360_v25 = vadd.f32 %v344_v58, %v276_v20  ;;  %v512_v57 = vmul.f32 %v1127_v23, %v459_v35  ;;  %v439_v24 = vadd.f32 %v1187_v28, %v1168_v31 }
  0xc0   : >> { %v447_v5 = vpop.permute.xlu1 %446  ;;  %832 = vtanh.f32 %v520_v59 }
  0xc1   : >> { %v497_v55 = vmul.f32 %v1121_v15, %v447_v5  ;;  %v498_v56 = vmul.f32 %v1123_v17, %v447_v5  ;;  %v499_v34 = vmul.f32 %v1125_v22, %v447_v5  ;;  %v500_v36 = vmul.f32 %v1127_v23, %v447_v5  ;;  %v551_v58 = vpop.permute.xlu0 %550 }
  0xc3   : >> { %v513_v39 = vadd.f32 %v497_v55, %v429_v45  ;;  %v514_v38 = vadd.f32 %v498_v56, %v430_v62  ;;  %v515_v50 = vadd.f32 %v499_v34, %v431_v63  ;;  %v516_v42 = vadd.f32 %v500_v36, %v432_v46 }
  0xc4   : >> { %v437_v62 = vadd.f32 %v421_v43, %v1161_v26  ;;  %v438_v63 = vadd.f32 %v422_v13, %v1166_v30  ;;  %v440_v43 = vadd.f32 %v1190_v61, %v1170_v37 }
  0xc5   : >> { %v375_v49 = vpop.permute.xlu1 %374  ;;  %834 = vtanh.f32 %v513_v39 }
  0xc6   : >> { %v425_v21 = vmul.f32 %v1110_v7, %v375_v49  ;;  %v426_v32 = vmul.f32 %v1112_v8, %v375_v49  ;;  %v427_v33 = vmul.f32 %v1114_v9, %v375_v49  ;;  %v428_v44 = vmul.f32 %v1119_v14, %v375_v49 }
  0xc7   : >> { %836 = vtanh.f32 %v514_v38  ;;  %v827_v12 = vpop.eup %826 }
  0xc8   : >> { %v441_v60 = vadd.f32 %v425_v21, %v357_v54  ;;  %v442_v45 = vadd.f32 %v426_v32, %v358_v18  ;;  %v443_v41 = vadd.f32 %v427_v33, %v359_v40  ;;  %v444_v7 = vadd.f32 %v428_v44, %v360_v25  ;;  %v829_v51 = vpop.eup %828 }
  0xc9   : >> { %838 = vtanh.f32 %v515_v50  ;;  %v831_v29 = vpop.eup %830  ;;  %v565_v35 = vmul.f32 %v827_v12, %v551_v58 }
  0xca   : >> { %v525_v8 = vadd.f32 %v509_v47, %v441_v60  ;;  %v526_v6 = vadd.f32 %v510_v52, %v442_v45  ;;  %v527_v9 = vadd.f32 %v511_v53, %v443_v41  ;;  %v455_v10 = vpop.permute.xlu1 %454  ;;  %840 = vtanh.f32 %v516_v42  ;;  %v833_v31 = vpop.eup %832 }
  0xcb   : >> { %v528_v46 = vadd.f32 %v512_v57, %v444_v7  ;;  %v505_v11 = vmul.f32 %v1121_v15, %v455_v10  ;;  %v506_v14 = vmul.f32 %v1123_v17, %v455_v10  ;;  %v507_v26 = vmul.f32 %v1125_v22, %v455_v10 }
  0xcc   : >> { %842 = vtanh.f32 %v525_v8  ;;  %v508_v30 = vmul.f32 %v1127_v23, %v455_v10  ;;  %v566_v52 = vmul.f32 %v829_v51, %v551_v58  ;;  %v567_v39 = vmul.f32 %v831_v29, %v551_v58 }
  0xcd   : >> { %844 = vtanh.f32 %v526_v6  ;;  %v521_v13 = vadd.f32 %v505_v11, %v437_v62  ;;  %v522_v27 = vadd.f32 %v506_v14, %v438_v63  ;;  %v523_v15 = vadd.f32 %v507_v26, %v439_v24 }
  0xce   : >> { %846 = vtanh.f32 %v527_v9  ;;  %v524_v17 = vadd.f32 %v508_v30, %v440_v43  ;;  %v568_v49 = vmul.f32 %v833_v31, %v551_v58 }
  0xcf   : >> { %848 = vtanh.f32 %v528_v46  ;;  %v547_v5 = vpop.permute.xlu1 %546  ;;  %v835_v28 = vpop.eup %834 }
  0xd0   : >> { %850 = vtanh.f32 %v521_v13  ;;  %v561_v56 = vmul.f32 %v835_v28, %v547_v5 }
  0xd1   : >> { %852 = vtanh.f32 %v522_v27  ;;  %v837_v22 = vpop.eup %836 }
  0xd2   : >> { %854 = vtanh.f32 %v523_v15  ;;  %v562_v59 = vmul.f32 %v837_v22, %v547_v5  ;;  %v577_v40 = vadd.f32 %v565_v35, %v561_v56  ;;  %v937_v15 = vmov 1966171168  }
  0xd3   : >> { %856 = vtanh.f32 %v524_v17  ;;  %v839_v23 = vpop.eup %838  ;;  %v555_v48 = vpop.permute.xlu1 %554  ;;  %v629_v29 = vunpack.c.l.s4 %v937_v15 }
  0xd4   : >> { %v841_v37 = vpop.eup %840  ;;  %v563_v36 = vmul.f32 %v839_v23, %v547_v5  ;;  %v586_v50 = vadd.f32 %v566_v52, %v562_v59 }
  0xd5   : >> { %v564_v53 = vmul.f32 %v841_v37, %v547_v5  ;;  %v630_v37 = vunpack.c.0.s8 %v629_v29 }
  0xd6   : >> { %v843_v61 = vpop.eup %842  ;;  %v595_v33 = vadd.f32 %v567_v39, %v563_v36 }
  0xd7   : >> { %v845_v55 = vpop.eup %844  ;;  %v559_v54 = vpop.permute.xlu1 %558  ;;  %v604_v60 = vadd.f32 %v568_v49, %v564_v53 }
  0xd8   : >> { %v847_v20 = vpop.eup %846  ;;  %v573_v57 = vmul.f32 %v843_v61, %v559_v54  ;;  %v574_v41 = vmul.f32 %v845_v55, %v559_v54  ;;  %v616_v61 = vpop.permute.xlu0 %615 }
  0xd9   : >> { %v849_v34 = vpop.eup %848  ;;  %v575_v63 = vmul.f32 %v847_v20, %v559_v54 }
  0xda   : >> { %v851_v47 = vpop.eup %850  ;;  %v576_v6 = vmul.f32 %v849_v34, %v559_v54 }
  0xdb   : >> { %v853_v18 = vpop.eup %852  ;;  %v569_v25 = vmul.f32 %v851_v47, %v555_v48  ;;  %v633_v47 = vsub.s32 %v630_v37, %v1072_v19 }
  0xdc   : >> { %v855_v38 = vpop.eup %854  ;;  %v570_v21 = vmul.f32 %v853_v18, %v555_v48 }
  0xdd   : >> { %v857_v32 = vpop.eup %856  ;;  %v571_v42 = vmul.f32 %v855_v38, %v555_v48  ;;  %v578_v44 = vadd.f32 %v577_v40, %v569_v25 }
  0xde   : >> { %v572_v45 = vmul.f32 %v857_v32, %v555_v48  ;;  %v587_v62 = vadd.f32 %v586_v50, %v570_v21 }
  0xdf   : >> { %v579_v7 = vadd.f32 %v578_v44, %v573_v57  ;;  %v596_v8 = vadd.f32 %v595_v33, %v571_v42 }
  0xe0   : >> { %v588_v9 = vadd.f32 %v587_v62, %v574_v41  ;;  %v605_v10 = vadd.f32 %v604_v60, %v572_v45 }
  0xe1   : >> { %v580_v46 = vrot.slane %v579_v7, 4  ;;  %v597_v11 = vadd.f32 %v596_v8, %v575_v63 }
  0xe2   : >> { %v589_v14 = vrot.slane %v588_v9, 4  ;;  %v606_v12 = vadd.f32 %v605_v10, %v576_v6 }
  0xe3   : >> { %v581_v24 = vadd.f32 %v580_v46, %v579_v7  ;;  %v598_v26 = vrot.slane %v597_v11, 4 }
  0xe4   : >> { %v590_v30 = vadd.f32 %v589_v14, %v588_v9  ;;  %v607_v43 = vrot.slane %v606_v12, 4 }
  0xe5   : >> { %v599_v13 = vadd.f32 %v598_v26, %v597_v11  ;;  %v582_v27 = vrot.slane %v581_v24, 2 }
  0xe6   : >> { %v608_v51 = vadd.f32 %v607_v43, %v606_v12  ;;  %v591_v17 = vrot.slane %v590_v30, 2 }
  0xe7   : >> { %v583_v5 = vadd.f32 %v582_v27, %v581_v24  ;;  %v600_v31 = vrot.slane %v599_v13, 2 }
  0xe8   : >> { %v592_v28 = vadd.f32 %v591_v17, %v590_v30  ;;  %v609_v22 = vrot.slane %v608_v51, 2 }
  0xe9   : >> { %v584_v23 = vrot.slane %v583_v5, 1  ;;  %v601_v48 = vadd.f32 %v600_v31, %v599_v13 }
  0xea   : >> { %v593_v58 = vrot.slane %v592_v28, 1  ;;  %v610_v55 = vadd.f32 %v609_v22, %v608_v51 }
  0xeb   : >> { %v585_v56 = vadd.f32 %v584_v23, %v583_v5  ;;  %v602_v20 = vrot.slane %v601_v48, 1 }
  0xec   : >> { %v594_v59 = vadd.f32 %v593_v58, %v592_v28  ;;  %v611_v34 = vrot.slane %v610_v55, 1 }
  0xed   : >> { %v603_v35 = vadd.f32 %v602_v20, %v601_v48  ;;  %v618_v36 = vadd.f32 %v616_v61, %v585_v56 }
  0xee   : >> { %v612_v52 = vadd.f32 %v611_v34, %v610_v55  ;;  %v619_v53 = vadd.f32 %v616_v61, %v594_v59 }
  0xef   : >> { %v620_v54 = vadd.f32 %v616_v61, %v603_v35 }
  0xf0   : >> { %v621_v18 = vadd.f32 %v616_v61, %v612_v52  ;;  %v626_v39 = vcombine.low %v618_v36, %v619_v53 }
  0xf2   : >> { %v627_v40 = vcombine.low %v620_v54, %v621_v18  ;;  %v634_v25 = vrot.slane %v626_v39, %v633_v47 }
  0xf4   : >> { %v641_v38 = vrot.slane %v627_v40, %v633_v47  ;;  %154 = sbr.rel (!%p152_p11) target bundleno = 24 (0x18), region = 72 }
  0xf6   : >> { %v642_v49 = vcombine.low %v634_v25, %v641_v38 }
  0xf8   : >> { %v649_v50 = vrot.slane %v642_v49, %v633_v47 }
  0xfa   : >> { %656 = vst.msk [vmem:[%s651_s7] sm:$0xf] %vm654_vm0, %v649_v50 }
  0xfb   : > { %871 = shalt.err (!%p868_p4)
}
  0xfc   : > { %s872_s13 = scalar_lea.hbm %s1231_s22, 128  ;;  %s876_s16 = scalar_lea.hbm %s1273_s2, 256 }
  0xfd   : > { %p873_p7 = scmp.ne.s32.totalorder %s1231_s22, %s872_s13  ;;  %p877_p10 = scmp.lt.u32.totalorder %s1231_s22, %s1273_s2 }
  0xfe   : > { %p878_p11 = scmp.lt.u32.totalorder %s876_s16, %s872_s13  ;;  %p880_p13 = scmp.lt.u32.totalorder %s872_s13, %s1231_s22 }
  0xff   : > { %p874_p8 = pnand %p873_p7, %p992_p5 }
 0x100   : > { %p879_p12 = por %p878_p11, %p877_p10 }
 0x101   : > { %p875_p9 = pneg %p874_p8 }
 0x102   : > { %p881_p0 = por %p880_p13, %p879_p12 }
 0x104   : > { %p882_p1 = pnand %p881_p0, %p875_p9 }
 0x106   : > { %885 = shalt.err (!%p882_p1)
}
 0x107   : > { %754 = dma.vmem_to_hbm [thread:$0]  (%p992_p5), %s673_s25, 128, %s1231_s22, %s658_s26  }
 0x108 PF: > { %p760_p2 = scmp.ge.s32.totalorder %s924_s12, 2  ;;  %s684_s4 = sand.u32 1, %s912_s9  }
 0x109   : > { %s685_s5 = scalar_lea.sflag [#allocation3], %s684_s4 }
 0x10a   : > { %p757_p3 = pnand %p760_p2, %p996_p6 }
 0x10c   : > { %907 = dma.done.wait (!%p757_p3), %s685_s5, 128  }
 0x10d   : > { %909 = vsyncadd (!%p757_p3), %s685_s5, 4294967168  ;;  %p12_p4 = scmp.ge.s32.totalorder %s979_s15, 4   ;;  %s1276_s9 = smov %s916_s10 }
 0x10e   : > { %s1277_s10 = smov %s920_s11  ;;  %s1278_s11 = smov %s990_s18 }
 0x10f   : > { %s1279_s12 = smov %s979_s15  ;;  %14 = sbr.rel (!%p12_p4) target bundleno = 3 (0x3), region = 83 }
 0x116   :  { %690 = vsyncpa [#allocation3], 1 }
 0x117   :  { %692 = vsyncpa [#allocation3 + $0x1], 1 }

</bundles_post_ra>
